<compile_context>
chip_gen: v5e
topology: v5e:2x2
jax: 0.10.0
libtpu: 0.0.40
codegen_flags: <defaults>
</compile_context>

<pallas_src>
import functools

import jax
import jax.numpy as jnp
from jax.experimental import pallas as pl
from jax.experimental.pallas import tpu as pltpu

_LANE = 128


def _round_up(v, m=_LANE):
    return ((v + m - 1) // m) * m


def _gelu_tanh(x):
    # GELU with tanh approximation (matches nn.GELU(approximate='tanh'))
    c = jnp.float32(0.7978845608028654)  # sqrt(2/pi)
    return 0.5 * x * (1.0 + jnp.tanh(c * (x + 0.044715 * x * x * x)))


def _decoder_kernel(*refs, n_layers, residual_flags, activate_flags):
    """Whole decoder for one (tm, D_pad) row block.

    refs = (x_ref, w0_ref, b0_ref, w1_ref, b1_ref, ..., o_ref)
    The layer loop is unrolled at trace time; the running activation `x`
    never leaves vregs/VMEM.
    """
    x_ref = refs[0]
    o_ref = refs[-1]
    wb = refs[1:-1]

    x = x_ref[...].astype(jnp.float32)
    for i in range(n_layers):
        w = wb[2 * i][...].astype(jnp.float32)        # (D_in_pad, D_out_pad)
        b = wb[2 * i + 1][...].astype(jnp.float32)    # (1, D_out_pad), broadcasts
        y = jnp.dot(x, w, preferred_element_type=jnp.float32) + b
        if residual_flags[i]:
            y = y + x                                 # x = x + layer(x)
        if activate_flags[i]:
            y = _gelu_tanh(y)
        x = y
    o_ref[...] = x.astype(o_ref.dtype)


def prepare_params(params):
    """One-time prep: transpose nn.Linear weights and zero-pad to 128 lanes.

    params: list of (W, b) with W shaped (out, in) like nn.Linear.
    Returns a flat list [w0_t, b0, w1_t, b1, ...] with
      w_t : (round128(in), round128(out))  (zero-padded, transposed)
      b   : (1, round128(out))             (zero-padded)
    Zero padding keeps the math exact: padded input lanes are zero, padded
    weight rows/cols are zero, gelu(0) == 0, so padded lanes stay zero through
    every residual layer.
    """
    flat = []
    for w, b in params:
        d_out, d_in = w.shape
        d_in_p, d_out_p = _round_up(d_in), _round_up(d_out)
        w_t = jnp.zeros((d_in_p, d_out_p), w.dtype).at[:d_in, :d_out].set(w.T)
        b_p = jnp.zeros((1, d_out_p), b.dtype).at[0, :d_out].set(b)
        flat.extend((w_t, b_p))
    return flat


def decoder_forward(x, prepped, d_out, tm=128):
    """Fused Pallas Decoder.forward.

    x       : (N, D_in) input points.
    prepped : output of prepare_params (pre-transposed, 128-padded weights).
    d_out   : true (unpadded) output feature width of the last layer.
    """
    n, d_in = x.shape
    n_layers = len(prepped) // 2
    d_in_p = prepped[0].shape[0]
    d_out_p = prepped[-2].shape[1]

    # Residual layers require matching in/out widths (same constraint as the
    # PyTorch module); check it on the padded shapes.
    for i in range(n_layers):
        if not (i == 0 or i == n_layers - 1):
            assert prepped[2 * i].shape[0] == prepped[2 * i].shape[1], (
                "residual layer requires D_in == D_out")

    # Pad rows to a multiple of tm (no silent row drop) and features to 128.
    n_blocks = pl.cdiv(n, tm)
    n_pad = n_blocks * tm
    x_p = jnp.zeros((n_pad, d_in_p), x.dtype).at[:n, :d_in].set(x)

    residual_flags = tuple(not (i == 0 or i == n_layers - 1) for i in range(n_layers))
    activate_flags = tuple(i != n_layers - 1 for i in range(n_layers))
    kernel = functools.partial(
        _decoder_kernel,
        n_layers=n_layers,
        residual_flags=residual_flags,
        activate_flags=activate_flags,
    )

    # Weights/biases: whole-array VMEM operands, no per-step blocking/pipelining.
    wb_specs = [pl.BlockSpec(memory_space=pltpu.MemorySpace.VMEM) for _ in prepped]

    out_p = pl.pallas_call(
        kernel,
        out_shape=jax.ShapeDtypeStruct((n_pad, d_out_p), x.dtype),
        grid_spec=pltpu.PrefetchScalarGridSpec(
            num_scalar_prefetch=0,
            grid=(n_blocks,),
            in_specs=[pl.BlockSpec((tm, d_in_p), lambda i: (i, 0))] + wb_specs,
            out_specs=pl.BlockSpec((tm, d_out_p), lambda i: (i, 0)),
        ),
        compiler_params=pltpu.CompilerParams(
            dimension_semantics=("parallel",)),
    )(x_p, *prepped)

    return out_p[:n, :d_out]


def decoder_reference(x, params):
    """Plain-JAX reference mirroring the PyTorch forward."""
    n_layers = len(params)
    for i, (w, b) in enumerate(params):
        y = x @ w.T + b
        if not (i == 0 or i == n_layers - 1):
            y = x + y
        x = y
        if i != n_layers - 1:
            x = _gelu_tanh(x)
    return x


def init_params(key, nn_dims):
    """Deterministic synthetic init for each nn.Linear(nn_dims[i], nn_dims[i+1])."""
    params = []
    for i in range(len(nn_dims) - 1):
        key, kw, kb = jax.random.split(key, 3)
        fan_in = nn_dims[i]
        bound = 1.0 / jnp.sqrt(jnp.float32(fan_in))
        w = jax.random.uniform(kw, (nn_dims[i + 1], nn_dims[i]),
                               minval=-bound, maxval=bound, dtype=jnp.float32)
        b = jax.random.uniform(kb, (nn_dims[i + 1],),
                               minval=-bound, maxval=bound, dtype=jnp.float32)
        params.append((w, b))
    return params


if __name__ == "__main__":
    # Decoder(nn_dims): middle layers are residual, so their in/out dims match.
    nn_dims = [32, 64, 64, 16]
    key = jax.random.PRNGKey(0)
    key, kx = jax.random.split(key)
    n_points = 256  # 2 row blocks of 128 -> both v7x TensorCores get work
    x = jax.random.normal(kx, (n_points, nn_dims[0]), dtype=jnp.float32)

    params = init_params(key, nn_dims)
    prepped = prepare_params(params)          # transpose + 128-lane pad, once

    out = decoder_forward(x, prepped, d_out=nn_dims[-1], tm=128)
    out = jax.block_until_ready(out)

    ref = decoder_reference(x, params)
    assert out.shape == (n_points, nn_dims[-1])
    assert jnp.allclose(out, ref, atol=1e-4, rtol=1e-4), "mismatch vs JAX reference"
    print("KERNEL_OK")
</pallas_src>

<mosaic_0001>
module attributes {stable_mosaic.version = 11 : i64} {
  func.func @_decoder_kernel(%arg0: i32, %arg1: memref<128x128xf32, #tpu.memory_space<vmem>>, %arg2: memref<128x128xf32, #tpu.memory_space<vmem>>, %arg3: memref<1x128xf32, #tpu.memory_space<vmem>>, %arg4: memref<128x128xf32, #tpu.memory_space<vmem>>, %arg5: memref<1x128xf32, #tpu.memory_space<vmem>>, %arg6: memref<128x128xf32, #tpu.memory_space<vmem>>, %arg7: memref<1x128xf32, #tpu.memory_space<vmem>>, %arg8: memref<128x128xf32, #tpu.memory_space<vmem>>) attributes {dimension_semantics = [#tpu.dimension_semantics<parallel>], iteration_bounds = array<i64: 2>, scalar_prefetch = 0 : i64, scratch_operands = 0 : i64, tpu.core_type = #tpu.core_type<tc>, window_params = [{transform_indices = @transform_0, window_bounds = array<i64: 128, 128>}, {pipeline_mode = #tpu.pipeline_mode<synchronous>, transform_indices = @transform_1, window_bounds = array<i64: 128, 128>}, {pipeline_mode = #tpu.pipeline_mode<synchronous>, transform_indices = @transform_2, window_bounds = array<i64: 1, 128>}, {pipeline_mode = #tpu.pipeline_mode<synchronous>, transform_indices = @transform_3, window_bounds = array<i64: 128, 128>}, {pipeline_mode = #tpu.pipeline_mode<synchronous>, transform_indices = @transform_4, window_bounds = array<i64: 1, 128>}, {pipeline_mode = #tpu.pipeline_mode<synchronous>, transform_indices = @transform_5, window_bounds = array<i64: 128, 128>}, {pipeline_mode = #tpu.pipeline_mode<synchronous>, transform_indices = @transform_6, window_bounds = array<i64: 1, 128>}, {transform_indices = @transform_7, window_bounds = array<i64: 128, 128>}]} {
    %c0 = arith.constant 0 : index
    %c0_0 = arith.constant 0 : index
    %0 = vector.load %arg1[%c0, %c0_0] : memref<128x128xf32, #tpu.memory_space<vmem>>, vector<128x128xf32>
    %c0_1 = arith.constant 0 : index
    %c0_2 = arith.constant 0 : index
    %1 = vector.load %arg2[%c0_1, %c0_2] : memref<128x128xf32, #tpu.memory_space<vmem>>, vector<128x128xf32>
    %c0_3 = arith.constant 0 : index
    %c0_4 = arith.constant 0 : index
    %2 = vector.load %arg3[%c0_3, %c0_4] : memref<1x128xf32, #tpu.memory_space<vmem>>, vector<1x128xf32>
    %cst = arith.constant dense<0.000000e+00> : vector<128x128xf32>
    %3 = tpu.matmul %0, %1, %cst {dimension_numbers = #tpu.dot_dimension_numbers<[1], [0], [0], [1], [0, 0, 1, 1], [], []>} : vector<128x128xf32>, vector<128x128xf32>, vector<128x128xf32> -> vector<128x128xf32>
    %4 = vector.broadcast %2 : vector<1x128xf32> to vector<128x128xf32>
    %5 = arith.addf %3, %4 : vector<128x128xf32>
    %cst_5 = arith.constant 5.000000e-01 : f32
    %6 = vector.broadcast %cst_5 : f32 to vector<128x128xf32>
    %7 = arith.mulf %6, %5 : vector<128x128xf32>
    %cst_6 = arith.constant 4.471500e-02 : f32
    %8 = vector.broadcast %cst_6 : f32 to vector<128x128xf32>
    %9 = arith.mulf %8, %5 : vector<128x128xf32>
    %10 = arith.mulf %9, %5 : vector<128x128xf32>
    %11 = arith.mulf %10, %5 : vector<128x128xf32>
    %12 = arith.addf %5, %11 : vector<128x128xf32>
    %cst_7 = arith.constant 0.797884583 : f32
    %13 = vector.broadcast %cst_7 : f32 to vector<128x128xf32>
    %14 = arith.mulf %13, %12 : vector<128x128xf32>
    %15 = math.tanh %14 : vector<128x128xf32>
    %cst_8 = arith.constant 1.000000e+00 : f32
    %16 = vector.broadcast %cst_8 : f32 to vector<128x128xf32>
    %17 = arith.addf %16, %15 : vector<128x128xf32>
    %18 = arith.mulf %7, %17 : vector<128x128xf32>
    %c0_9 = arith.constant 0 : index
    %c0_10 = arith.constant 0 : index
    %19 = vector.load %arg4[%c0_9, %c0_10] : memref<128x128xf32, #tpu.memory_space<vmem>>, vector<128x128xf32>
    %c0_11 = arith.constant 0 : index
    %c0_12 = arith.constant 0 : index
    %20 = vector.load %arg5[%c0_11, %c0_12] : memref<1x128xf32, #tpu.memory_space<vmem>>, vector<1x128xf32>
    %cst_13 = arith.constant dense<0.000000e+00> : vector<128x128xf32>
    %21 = tpu.matmul %18, %19, %cst_13 {dimension_numbers = #tpu.dot_dimension_numbers<[1], [0], [0], [1], [0, 0, 1, 1], [], []>} : vector<128x128xf32>, vector<128x128xf32>, vector<128x128xf32> -> vector<128x128xf32>
    %22 = vector.broadcast %20 : vector<1x128xf32> to vector<128x128xf32>
    %23 = arith.addf %21, %22 : vector<128x128xf32>
    %24 = arith.addf %23, %18 : vector<128x128xf32>
    %cst_14 = arith.constant 5.000000e-01 : f32
    %25 = vector.broadcast %cst_14 : f32 to vector<128x128xf32>
    %26 = arith.mulf %25, %24 : vector<128x128xf32>
    %cst_15 = arith.constant 4.471500e-02 : f32
    %27 = vector.broadcast %cst_15 : f32 to vector<128x128xf32>
    %28 = arith.mulf %27, %24 : vector<128x128xf32>
    %29 = arith.mulf %28, %24 : vector<128x128xf32>
    %30 = arith.mulf %29, %24 : vector<128x128xf32>
    %31 = arith.addf %24, %30 : vector<128x128xf32>
    %cst_16 = arith.constant 0.797884583 : f32
    %32 = vector.broadcast %cst_16 : f32 to vector<128x128xf32>
    %33 = arith.mulf %32, %31 : vector<128x128xf32>
    %34 = math.tanh %33 : vector<128x128xf32>
    %cst_17 = arith.constant 1.000000e+00 : f32
    %35 = vector.broadcast %cst_17 : f32 to vector<128x128xf32>
    %36 = arith.addf %35, %34 : vector<128x128xf32>
    %37 = arith.mulf %26, %36 : vector<128x128xf32>
    %c0_18 = arith.constant 0 : index
    %c0_19 = arith.constant 0 : index
    %38 = vector.load %arg6[%c0_18, %c0_19] : memref<128x128xf32, #tpu.memory_space<vmem>>, vector<128x128xf32>
    %c0_20 = arith.constant 0 : index
    %c0_21 = arith.constant 0 : index
    %39 = vector.load %arg7[%c0_20, %c0_21] : memref<1x128xf32, #tpu.memory_space<vmem>>, vector<1x128xf32>
    %cst_22 = arith.constant dense<0.000000e+00> : vector<128x128xf32>
    %40 = tpu.matmul %37, %38, %cst_22 {dimension_numbers = #tpu.dot_dimension_numbers<[1], [0], [0], [1], [0, 0, 1, 1], [], []>} : vector<128x128xf32>, vector<128x128xf32>, vector<128x128xf32> -> vector<128x128xf32>
    %41 = vector.broadcast %39 : vector<1x128xf32> to vector<128x128xf32>
    %42 = arith.addf %40, %41 : vector<128x128xf32>
    %c0_23 = arith.constant 0 : index
    %c0_24 = arith.constant 0 : index
    %43 = vector.load %arg8[%c0_23, %c0_24] : memref<128x128xf32, #tpu.memory_space<vmem>>, vector<128x128xf32>
    tpu.vector_store %arg8[%c0_23, %c0_24], %42 {strides = array<i32>} : memref<128x128xf32, #tpu.memory_space<vmem>>, vector<128x128xf32>,
    return
  }
  func.func @transform_0(%arg0: i32) -> (i32, i32) {
    %c0_i32 = arith.constant 0 : i32
    %c0_i32_0 = arith.constant 0 : i32
    return %arg0, %c0_i32 : i32, i32
  }
  func.func @transform_1(%arg0: i32) -> (i32, i32) {
    %c0_i32 = arith.constant 0 : i32
    %c0_i32_0 = arith.constant 0 : i32
    %c0_i32_1 = arith.constant 0 : i32
    return %c0_i32, %c0_i32_0 : i32, i32
  }
  func.func @transform_2(%arg0: i32) -> (i32, i32) {
    %c0_i32 = arith.constant 0 : i32
    %c0_i32_0 = arith.constant 0 : i32
    %c0_i32_1 = arith.constant 0 : i32
    return %c0_i32, %c0_i32_0 : i32, i32
  }
  func.func @transform_3(%arg0: i32) -> (i32, i32) {
    %c0_i32 = arith.constant 0 : i32
    %c0_i32_0 = arith.constant 0 : i32
    %c0_i32_1 = arith.constant 0 : i32
    return %c0_i32, %c0_i32_0 : i32, i32
  }
  func.func @transform_4(%arg0: i32) -> (i32, i32) {
    %c0_i32 = arith.constant 0 : i32
    %c0_i32_0 = arith.constant 0 : i32
    %c0_i32_1 = arith.constant 0 : i32
    return %c0_i32, %c0_i32_0 : i32, i32
  }
  func.func @transform_5(%arg0: i32) -> (i32, i32) {
    %c0_i32 = arith.constant 0 : i32
    %c0_i32_0 = arith.constant 0 : i32
    %c0_i32_1 = arith.constant 0 : i32
    return %c0_i32, %c0_i32_0 : i32, i32
  }
  func.func @transform_6(%arg0: i32) -> (i32, i32) {
    %c0_i32 = arith.constant 0 : i32
    %c0_i32_0 = arith.constant 0 : i32
    %c0_i32_1 = arith.constant 0 : i32
    return %c0_i32, %c0_i32_0 : i32, i32
  }
  func.func @transform_7(%arg0: i32) -> (i32, i32) {
    %c0_i32 = arith.constant 0 : i32
    %c0_i32_0 = arith.constant 0 : i32
    return %arg0, %c0_i32 : i32, i32
  }
}

</mosaic_0001>

<bundles_post_ra>
// kernel: tpu_custom_call.1
= control target key start
LH: loop header
LB: loop body
LE: loop exit
PB: predicated region body
PF: predicated region fallthrough
CT: control target
= control target key end

     0   :  { %s1848_s0 = inlined_call_operand.hbm [shape: f32[256,128], index: 0, kind: input, shape index: {}]   ;;  %s1849_s1 = inlined_call_operand.hbm [shape: f32[128,128], index: 1, kind: input, shape index: {}]   ;;  %s1850_s2 = inlined_call_operand.vmem [shape: f32[1,128], index: 2, kind: input, shape index: {}]   ;;  %s1851_s3 = inlined_call_operand.hbm [shape: f32[128,128], index: 3, kind: input, shape index: {}]   ;;  %s1852_s4 = inlined_call_operand.vmem [shape: f32[1,128], index: 4, kind: input, shape index: {}]   ;;  %s1853_s5 = inlined_call_operand.hbm [shape: f32[128,128], index: 5, kind: input, shape index: {}]   ;;  %s1854_s6 = inlined_call_operand.vmem [shape: f32[1,128], index: 6, kind: input, shape index: {}]   ;;  %s1855_s7 = inlined_call_operand.hbm [shape: f32[256,128], index: 7, kind: output, shape index: {}]  }
   0x1   :  { %1858 = sst [smem:[#allocation15_spill]] %s1849_s1 }
   0x2   :  { %12 = vsyncpa [#allocation3], 0 }
   0x3   :  { %14 = vsyncpa [#allocation3 + $0x1], 0 }
   0x4   :  { %15 = vsyncpa [#allocation6], 0 }
   0x5   :  { %16 = vsyncpa [#allocation9], 0 }
   0x6   :  { %17 = vsyncpa [#allocation4], 0 }
   0x7   :  { %19 = vsyncpa [#allocation4 + $0x1], 0  ;;  %s1521_s24 = smov 0   ;;  %s1523_s25 = smov 0  }
   0x8   :  { %s1525_s26 = smov 0   ;;  %s1527_s27 = smov 0  }
   0x9 LB: > { %s1542_s28 = sadd.s32 4294967295, %s1472_s27   ;;  %s1060_s29 = sadd.s32 4294967294, %s1472_s27   ;;  %s1472_s27 = sphi %s1527_s27, %s1872_s27   ;;  %s1468_s26 = sphi %s1525_s26, %s1871_s26   ;;  %s1464_s25 = sphi %s1523_s25, %s1870_s25   ;;  %s1460_s24 = sphi %s1521_s24, %s1869_s24  }
   0xa   : > { %p45_p0 = scmp.ne.s32.totalorder %s1464_s25, %s1460_s24  ;;  %p46_p1 = scmp.eq.s32.totalorder %s1542_s28, 0 }
   0xb   : > { %p195_p2 = scmp.eq.s32.totalorder %s1542_s28, 1  ;;  %p201_p3 = scmp.eq.s32.totalorder %s1060_s29, 1 }
   0xc   : > { %p1551_p4 = por %p46_p1, %p45_p0  ;;  %p1061_p5 = scmp.ge.s32.totalorder %s1472_s27, 1 }
   0xd   : > { %p1556_p6 = por %p201_p3, %p45_p0  ;;  %p208_p7 = scmp.lt.s32.totalorder %s1472_s27, 3 }
   0xe   : > { %s1861_s1 = sld [smem:[#allocation15_spill]]  ;;  %s1474_s13 = smov [#allocation5]  }
   0xf   : > { %p1564_p8 = pnand %p1061_p5, %p208_p7  ;;  %s221_s14 = sshll.u32 %s1474_s13, 4  ;;  %s222_s14 = int_to_ptr.vmem [resolvable:$true] %s221_s14 }
  0x10   : > { %s236_s18 = sshll.u32 %s1851_s3, 4  ;;  %s1856_s19 = smov 128   ;;  %s237_s18 = int_to_ptr.hbm [resolvable:$true] %s236_s18 }
  0x11   : > { %p1146_p9 = pneg %p1564_p8  ;;  %s1857_s20 = smov 8  }
  0x12   : > { %s1477_s21 = smov [#allocation7]   ;;  %s253_s9 = sshll.u32 %s1853_s5, 4  ;;  %s254_s9 = int_to_ptr.hbm [resolvable:$true] %s253_s9 }
  0x13   : > { %p1572_p10 = pnand %p1146_p9, %p46_p1  ;;  %s238_s22 = sshll.u32 %s1477_s21, 4  ;;  %s239_s22 = int_to_ptr.vmem [resolvable:$true] %s238_s22 }
  0x14   : > { %s219_s11 = sshll.u32 %s1861_s1, 4  ;;  %s1478_s10 = smov [#allocation8]   ;;  %s220_s11 = int_to_ptr.hbm [resolvable:$true] %s219_s11 }
  0x15   : > { %1149 = dma.hbm_to_vmem [thread:$0]  (!%p1572_p10), %s220_s11, 2048, %s222_s14, [#allocation6], %s1856_s19, %s1856_s19, %s1857_s20  }
  0x16   : > { %1152 = dma.hbm_to_vmem [thread:$0]  (!%p1572_p10), %s237_s18, 2048, %s239_s22, [#allocation6], %s1856_s19, %s1856_s19, %s1857_s20  }
  0x17   : > { %s255_s11 = sshll.u32 %s1478_s10, 4  ;;  %s1594_s13 = sadd.s32 1, %s1472_s27   ;;  %s256_s11 = int_to_ptr.vmem [resolvable:$true] %s255_s11 }
  0x18   : > { %1155 = dma.hbm_to_vmem [thread:$0]  (!%p1572_p10), %s254_s9, 2048, %s256_s11, [#allocation9], %s1856_s19, %s1856_s19, %s1857_s20  }
  0x19   : > { %s29_s14 = ssub.s32 %s1472_s27, %s1594_s13  ;;  %s32_s16 = sadd.s32 1, %s1468_s26 }
  0x1a   : > { %p30_p12 = scmp.eq.s32.totalorder %s29_s14, 0  ;;  %p39_p13 = scmp.ne.s32.totalorder %s1468_s26, %s1464_s25 }
  0x1b   : > { %p40_p0 = scmp.eq.s32.totalorder %s1472_s27, 0  ;;  %p1167_p5 = scmp.lt.s32.totalorder %s1472_s27, 2 }
  0x1c   : > { %s1608_s17 = scalar_select %p30_p12, %s1468_s26, %s32_s16  }
  0x1d   : > { %p1612_p3 = por %p195_p2, %p39_p13  ;;  %s272_s21 = sand.u32 1, %s1468_s26  }
  0x1e   : > { %s1080_s15 = sshll.u32 %s1472_s27, 7  ;;  %p41_p7 = por %p40_p0, %p39_p13 }
  0x1f   : > { %s1066_s22 = sshll.u32 %s272_s21, 7  ;;  %s281_s9 = scalar_lea.hbm %s1848_s0, %s1080_s15 }
  0x20   : > { %s282_s10 = sshll.u32 %s281_s9, 4  ;;  %s276_s11 = scalar_lea.vmem [#allocation2], %s1066_s22  ;;  %s283_s10 = int_to_ptr.hbm [resolvable:$true] %s282_s10 }
  0x21   : > { %s284_s14 = sshll.u32 %s276_s11, 4  ;;  %p1622_p9 = pnand %p1167_p5, %p41_p7  ;;  %s285_s14 = int_to_ptr.vmem [resolvable:$true] %s284_s14 }
  0x22   : > { %s273_s19 = scalar_lea.sflag [#allocation3], %s272_s21  ;;  %s1368_s20 = sshra.s32 %s283_s10, 4  ;;  %s1369_s20 = int_to_ptr.hbm [resolvable:$true] %s1368_s20 }
  0x23   : > { %s1370_s1 = scalar_lea.hbm %s1369_s20, 128  ;;  %p1372_p10 = pneg %p1622_p9 }
  0x24   : > { %p1371_p2 = scmp.ne.s32.totalorder %s1369_s20, %s1370_s1  ;;  %s1375_s22 = scalar_lea.hbm %s1848_s0, 256 }
  0x25   : > { %p1376_p0 = scmp.lt.s32.totalorder %s1369_s20, %s1848_s0  ;;  %p1377_p5 = scmp.lt.s32.totalorder %s1375_s22, %s1370_s1 }
  0x26   : > { %p1373_p12 = pnand %p1372_p10, %p1371_p2 }
  0x27   : > { %p1378_p7 = por %p1377_p5, %p1376_p0 }
  0x28   : > { %p1374_p13 = pneg %p1373_p12 }
  0x2a   : > { %p1379_p11 = pnand %p1378_p7, %p1374_p13 }
  0x2c   : > { %1382 = shalt.err (!%p1379_p11)
}
  0x2d   : > { %s1866_s21 = smov 8   ;;  %s1867_s11 = smov 128  }
  0x2e   : > { %1159 = dma.hbm_to_vmem [thread:$0]  (!%p1622_p9), %s283_s10, 2048, %s285_s14, %s273_s19, %s1867_s11, %s1867_s11, %s1866_s21  }
  0x2f   : > { %296 = sbr.rel (%p1564_p8) target bundleno = 615 (0x267), region = 48  ;;  %s1642_s15 = sand.u32 (!%p1564_p8), 1, %s1464_s25  }
  0x30   : > { %s1070_s1 = sshll.u32 (!%p1564_p8), %s1642_s15, 7  ;;  %s299_s20 = scalar_lea.sflag (!%p1564_p8), [#allocation3], %s1642_s15 }
  0x31   : > { %s1648_s23 = scalar_lea.vmem (!%p1564_p8), [#allocation2], %s1070_s1 }
  0x34   : > { %1443 = dma.done.wait (%p1551_p4), %s299_s20, 2048  }
  0x35   : > { %1445 = vsyncadd (%p1551_p4), %s299_s20, 4294965248 }
  0x36   : > { %1447 = dma.done.wait (%p46_p1), [#allocation6], 4096  }
  0x37   : > { %1449 = vsyncadd (%p46_p1), [#allocation6], 4294963200 }
  0x38   : > { %1451 = dma.done.wait (%p46_p1), [#allocation9], 2048  }
  0x39   : > { %1453 = vsyncadd (%p46_p1), [#allocation9], 4294965248  ;;  %v382_v0 = vld [vmem:[#allocation5 + $0x78] sm:$0xff]  ;;  %v381_v1 = vld [vmem:[#allocation5 + $0x70] sm:$0xff]  ;;  %s1796_s22 = scalar_lea.vmem [#allocation10], %s1070_s1  ;;  %s1081_s29 = sshll.u32 %s1542_s28, 7 }
  0x3a   : > { %387 = vmatpush.msra.mxu0 %v382_v0  ;;  %1082 = vmatpush.msra.mxu3 %v382_v0  ;;  %v380_v2 = vld [vmem:[#allocation5 + $0x68] sm:$0xff]  ;;  %v379_v3 = vld [vmem:[#allocation5 + $0x60] sm:$0xff]  ;;  %v378_v4 = vld [vmem:[#allocation5 + $0x58] sm:$0xff]  ;;  %s954_s11 = scalar_lea.hbm %s1855_s7, %s1081_s29  ;;  %s955_s1 = sshll.u32 %s1796_s22, 4  ;;  %s956_s1 = int_to_ptr.vmem [resolvable:$true] %s955_s1 }
  0x3b   : > { %v377_v5 = vld [vmem:[#allocation5 + $0x50] sm:$0xff]  ;;  %v376_v6 = vld [vmem:[#allocation5 + $0x48] sm:$0xff]  ;;  %v375_v7 = vld [vmem:[#allocation5 + $0x40] sm:$0xff]  ;;  %s957_s20 = sshll.u32 %s954_s11, 4  ;;  %s1418_s10 = scalar_lea.hbm %s1855_s7, 256  ;;  %s958_s20 = int_to_ptr.hbm [resolvable:$true] %s957_s20 }
  0x3c   : > { %388 = vmatpush.msra.mxu0 %v381_v1  ;;  %1083 = vmatpush.msra.mxu3 %v381_v1  ;;  %v374_v8 = vld [vmem:[#allocation5 + $0x38] sm:$0xff]  ;;  %v373_v9 = vld [vmem:[#allocation5 + $0x30] sm:$0xff]  ;;  %v372_v10 = vld [vmem:[#allocation5 + $0x28] sm:$0xff]  ;;  %s1412_s30 = sshra.s32 %s958_s20, 4  ;;  %s1413_s30 = int_to_ptr.hbm [resolvable:$true] %s1412_s30 }
  0x3d   : > { %v371_v11 = vld [vmem:[#allocation5 + $0x20] sm:$0xff]  ;;  %v370_v12 = vld [vmem:[#allocation5 + $0x18] sm:$0xff]  ;;  %v369_v13 = vld [vmem:[#allocation5 + $0x10] sm:$0xff]  ;;  %s1414_s12 = scalar_lea.hbm %s1413_s30, 128  ;;  %p1419_p11 = scmp.lt.s32.totalorder %s1413_s30, %s1855_s7 }
  0x3e   : > { %389 = vmatpush.msra.mxu0 %v380_v2  ;;  %1084 = vmatpush.msra.mxu3 %v380_v2  ;;  %v368_v14 = vld [vmem:[#allocation5 + $0x8] sm:$0xff]  ;;  %v367_v15 = vld [vmem:[#allocation5] sm:$0xff]  ;;  %v353_v20 = vld [vmem:[%s1648_s23 + $0x10] sm:$0xff]  ;;  %p1415_p1 = scmp.ne.s32.totalorder %s1413_s30, %s1414_s12  ;;  %p1420_p9 = scmp.lt.s32.totalorder %s1418_s10, %s1414_s12 }
  0x3f   : > { %v351_v16 = vld [vmem:[%s1648_s23] sm:$0xff]  ;;  %v352_v18 = vld [vmem:[%s1648_s23 + $0x8] sm:$0xff]  ;;  %v365_v21 = vld [vmem:[%s1648_s23 + $0x70] sm:$0xff] }
  0x40   : > { %390 = vmatpush.msra.mxu0 %v379_v3  ;;  %1085 = vmatpush.msra.mxu3 %v379_v3  ;;  %v363_v17 = vld [vmem:[%s1648_s23 + $0x60] sm:$0xff]  ;;  %v364_v19 = vld [vmem:[%s1648_s23 + $0x68] sm:$0xff]  ;;  %v354_v22 = vld [vmem:[%s1648_s23 + $0x18] sm:$0xff]  ;;  %p1416_p4 = pnand %p1415_p1, %p1612_p3  ;;  %p1421_p2 = por %p1420_p9, %p1419_p11 }
  0x41   : > { %v366_v23 = vld [vmem:[%s1648_s23 + $0x78] sm:$0xff]  ;;  %v355_v24 = vld [vmem:[%s1648_s23 + $0x20] sm:$0xff]  ;;  %v356_v25 = vld [vmem:[%s1648_s23 + $0x28] sm:$0xff] }
  0x42   : > { %391 = vmatpush.msra.mxu0 %v378_v4  ;;  %1086 = vmatpush.msra.mxu3 %v378_v4  ;;  %v357_v26 = vld [vmem:[%s1648_s23 + $0x30] sm:$0xff]  ;;  %v358_v27 = vld [vmem:[%s1648_s23 + $0x38] sm:$0xff]  ;;  %v609_v30 = vld [vmem:[#allocation7 + $0x68] sm:$0xff]  ;;  %p1417_p8 = pneg %p1416_p4 }
  0x43   : > { %v611_v28 = vld [vmem:[#allocation7 + $0x78] sm:$0xff]  ;;  %v610_v29 = vld [vmem:[#allocation7 + $0x70] sm:$0xff]  ;;  %v608_v31 = vld [vmem:[#allocation7 + $0x60] sm:$0xff] }
  0x44   : > { %392 = vmatpush.msra.mxu0 %v377_v5  ;;  %1087 = vmatpush.msra.mxu3 %v377_v5  ;;  %v359_v32 = vld [vmem:[%s1648_s23 + $0x40] sm:$0xff]  ;;  %v360_v33 = vld [vmem:[%s1648_s23 + $0x48] sm:$0xff]  ;;  %v361_v34 = vld [vmem:[%s1648_s23 + $0x50] sm:$0xff]  ;;  %p1422_p10 = pnand %p1421_p2, %p1417_p8 }
  0x45   : > { %616 = vmatpush.msra.mxu1 %v611_v28  ;;  %v362_v35 = vld [vmem:[%s1648_s23 + $0x58] sm:$0xff]  ;;  %v606_v37 = vld [vmem:[#allocation7 + $0x50] sm:$0xff]  ;;  %v605_v38 = vld [vmem:[#allocation7 + $0x48] sm:$0xff]  ;;  %s943_s23 = scalar_lea.sflag [#allocation4], %s1642_s15 }
  0x46   : > { %393 = vmatpush.msra.mxu0 %v376_v6  ;;  %1088 = vmatpush.msra.mxu3 %v376_v6  ;;  %v607_v36 = vld [vmem:[#allocation7 + $0x58] sm:$0xff]  ;;  %v604_v39 = vld [vmem:[#allocation7 + $0x40] sm:$0xff]  ;;  %v602_v41 = vld [vmem:[#allocation7 + $0x30] sm:$0xff] }
  0x47   : > { %617 = vmatpush.msra.mxu1 %v610_v29  ;;  %v603_v40 = vld [vmem:[#allocation7 + $0x38] sm:$0xff]  ;;  %v601_v42 = vld [vmem:[#allocation7 + $0x28] sm:$0xff]  ;;  %v600_v43 = vld [vmem:[#allocation7 + $0x20] sm:$0xff] }
  0x48   : > { %394 = vmatpush.msra.mxu0 %v375_v7  ;;  %1089 = vmatpush.msra.mxu3 %v375_v7  ;;  %v599_v44 = vld [vmem:[#allocation7 + $0x18] sm:$0xff]  ;;  %v598_v45 = vld [vmem:[#allocation7 + $0x10] sm:$0xff]  ;;  %v597_v46 = vld [vmem:[#allocation7 + $0x8] sm:$0xff] }
  0x49   : > { %618 = vmatpush.msra.mxu1 %v609_v30  ;;  %v596_v47 = vld [vmem:[#allocation7] sm:$0xff] }
  0x4a   : > { %395 = vmatpush.msra.mxu0 %v374_v8  ;;  %1090 = vmatpush.msra.mxu3 %v374_v8  ;;  %v1681_v48 = vld [vmem:[%s1850_s2] ss:$0 sm:$0xff] }
  0x4b   : > { %619 = vmatpush.msra.mxu1 %v608_v31 }
  0x4c   : > { %396 = vmatpush.msra.mxu0 %v373_v9  ;;  %1091 = vmatpush.msra.mxu3 %v373_v9 }
  0x4d   : > { %620 = vmatpush.msra.mxu1 %v607_v36 }
  0x4e   : > { %397 = vmatpush.msra.mxu0 %v372_v10  ;;  %1092 = vmatpush.msra.mxu3 %v372_v10 }
  0x4f   : > { %621 = vmatpush.msra.mxu1 %v606_v37 }
  0x50   : > { %398 = vmatpush.msra.mxu0 %v371_v11  ;;  %1093 = vmatpush.msra.mxu3 %v371_v11 }
  0x51   : > { %622 = vmatpush.msra.mxu1 %v605_v38 }
  0x52   : > { %399 = vmatpush.msra.mxu0 %v370_v12  ;;  %1094 = vmatpush.msra.mxu3 %v370_v12 }
  0x53   : > { %623 = vmatpush.msra.mxu1 %v604_v39 }
  0x54   : > { %400 = vmatpush.msra.mxu0 %v369_v13  ;;  %1095 = vmatpush.msra.mxu3 %v369_v13 }
  0x55   : > { %624 = vmatpush.msra.mxu1 %v603_v40 }
  0x56   : > { %401 = vmatpush.msra.mxu0 %v368_v14  ;;  %1096 = vmatpush.msra.mxu3 %v368_v14 }
  0x57   : > { %625 = vmatpush.msra.mxu1 %v602_v41 }
  0x58   : > { %402 = vmatpush.msra.mxu0 %v367_v15  ;;  %1097 = vmatpush.msra.mxu3 %v367_v15 }
  0x59   : > { %403 = vmatmul.f32.vlgmr.msra.gmra.mxu0 %v351_v16  ;;  %439 = vmatmul.f32.vlgmr.msra.gmra.mxu3 %v363_v17 }
  0x5a   : > { %1098 = vmatpush.msrb.mxu3 %v611_v28  ;;  %626 = vmatpush.msra.mxu1 %v601_v42 }
  0x5c   : > { %1099 = vmatpush.msrb.mxu3 %v610_v29  ;;  %627 = vmatpush.msra.mxu1 %v600_v43 }
  0x5e   : > { %1100 = vmatpush.msrb.mxu3 %v609_v30  ;;  %628 = vmatpush.msra.mxu1 %v599_v44 }
  0x60   : > { %1101 = vmatpush.msrb.mxu3 %v608_v31  ;;  %629 = vmatpush.msra.mxu1 %v598_v45 }
  0x61   : > { %406 = vmatmul.f32.gmra.mxu0 %v352_v18  ;;  %442 = vmatmul.f32.gmra.mxu3 %v364_v19 }
  0x62   : > { %1102 = vmatpush.msrb.mxu3 %v607_v36  ;;  %630 = vmatpush.msra.mxu1 %v597_v46 }
  0x64   : > { %1103 = vmatpush.msrb.mxu3 %v606_v37  ;;  %631 = vmatpush.msra.mxu1 %v596_v47 }
  0x66   : > { %1104 = vmatpush.msrb.mxu3 %v605_v38 }
  0x68   : > { %1105 = vmatpush.msrb.mxu3 %v604_v39 }
  0x69   : > { %409 = vmatmul.f32.gmra.mxu0 %v353_v20  ;;  %445 = vmatmul.f32.gmra.mxu3 %v365_v21 }
  0x6a   : > { %1106 = vmatpush.msrb.mxu3 %v603_v40 }
  0x6c   : > { %1107 = vmatpush.msrb.mxu3 %v602_v41 }
  0x6e   : > { %1108 = vmatpush.msrb.mxu3 %v601_v42 }
  0x70   : > { %1109 = vmatpush.msrb.mxu3 %v600_v43 }
  0x71   : > { %412 = vmatmul.f32.gmra.mxu0 %v354_v22  ;;  %448 = vmatmul.f32.gmra.mxu3 %v366_v23 }
  0x72   : > { %1110 = vmatpush.msrb.mxu3 %v599_v44 }
  0x74   : > { %1111 = vmatpush.msrb.mxu3 %v598_v45 }
  0x76   : > { %1112 = vmatpush.msrb.mxu3 %v597_v46 }
  0x78   : > { %1113 = vmatpush.msrb.mxu3 %v596_v47 }
  0x79   : > { %415 = vmatmul.f32.gmra.mxu0 %v355_v24 }
  0x81   : > { %418 = vmatmul.f32.gmra.mxu0 %v356_v25 }
  0x89   : > { %421 = vmatmul.f32.gmra.mxu0 %v357_v26 }
  0x91   : > { %424 = vmatmul.f32.gmra.mxu0 %v358_v27 }
  0x99   : > { %427 = vmatmul.f32.gmra.mxu0 %v359_v32 }
  0xa1   : > { %430 = vmatmul.f32.gmra.mxu0 %v360_v33 }
  0xa9   : > { %433 = vmatmul.f32.gmra.mxu0 %v361_v34 }
  0xb1   : > { %436 = vmatmul.f32.gmra.mxu0 %v362_v35 }
  0xd6   : > { %v404_v49 = vpop.f32.mrf.mxu0 }
  0xd7   : > { %v405_v50 = vadd.f32 %v1681_v48, %v404_v49 }
  0xd9   : > { %v468_v51 = vmul.f32 0.044715, %v405_v50  ;;  %v452_v13 = vmul.f32 0.5, %v405_v50 }
  0xdb   : > { %v484_v52 = vmul.f32 %v468_v51, %v405_v50 }
  0xdc   : > { %v440_v53 = vpop.f32.mrf.mxu3 }
  0xdd   : > { %v441_v54 = vadd.f32 %v1681_v48, %v440_v53  ;;  %v500_v55 = vmul.f32 %v484_v52, %v405_v50 }
  0xde   : > { %v407_v56 = vpop.f32.mrf.mxu0 }
  0xdf   : > { %v480_v57 = vmul.f32 0.044715, %v441_v54  ;;  %v408_v58 = vadd.f32 %v1681_v48, %v407_v56  ;;  %v516_v59 = vadd.f32 %v500_v55, %v405_v50  ;;  %v464_v23 = vmul.f32 0.5, %v441_v54 }
  0xe1   : > { %v532_v60 = vmul.f32 0.7978846, %v516_v59  ;;  %v496_v61 = vmul.f32 %v480_v57, %v441_v54  ;;  %v469_v62 = vmul.f32 0.044715, %v408_v58  ;;  %v453_v36 = vmul.f32 0.5, %v408_v58 }
  0xe3   : > { %1214 = vtanh.f32 %v532_v60  ;;  %v512_v63 = vmul.f32 %v496_v61, %v441_v54  ;;  %v485_v0 = vmul.f32 %v469_v62, %v408_v58 }
  0xe4   : > { %v443_v1 = vpop.f32.mrf.mxu3 }
  0xe5   : > { %v444_v2 = vadd.f32 %v1681_v48, %v443_v1  ;;  %v528_v3 = vadd.f32 %v512_v63, %v441_v54  ;;  %v501_v4 = vmul.f32 %v485_v0, %v408_v58 }
  0xe6   : > { %v410_v5 = vpop.f32.mrf.mxu0 }
  0xe7   : > { %v411_v6 = vadd.f32 %v1681_v48, %v410_v5  ;;  %v544_v7 = vmul.f32 0.7978846, %v528_v3  ;;  %v517_v8 = vadd.f32 %v501_v4, %v408_v58  ;;  %v481_v9 = vmul.f32 0.044715, %v444_v2 }
  0xe8   : > { %v465_v47 = vmul.f32 0.5, %v444_v2 }
  0xe9   : > { %v1215_v10 = vpop.eup %1214  ;;  %1216 = vtanh.f32 %v544_v7  ;;  %v533_v11 = vmul.f32 0.7978846, %v517_v8  ;;  %v470_v12 = vmul.f32 0.044715, %v411_v6  ;;  %v497_v15 = vmul.f32 %v481_v9, %v444_v2 }
  0xea   : > { %v564_v14 = vadd.f32 1.0, %v1215_v10  ;;  %v454_v56 = vmul.f32 0.5, %v411_v6 }
  0xeb   : > { %1218 = vtanh.f32 %v533_v11  ;;  %v486_v16 = vmul.f32 %v470_v12, %v411_v6  ;;  %v513_v19 = vmul.f32 %v497_v15, %v444_v2 }
  0xec   : > { %v446_v17 = vpop.f32.mrf.mxu3  ;;  %v1688_v18 = vmul.f32 %v564_v14, %v452_v13 }
  0xed   : > { %v447_v20 = vadd.f32 %v1681_v48, %v446_v17  ;;  %v502_v21 = vmul.f32 %v486_v16, %v411_v6  ;;  %v529_v24 = vadd.f32 %v513_v19, %v444_v2 }
  0xee   : > { %v413_v22 = vpop.f32.mrf.mxu0  ;;  %632 = vmatmul.f32.vlgmr.msra.gmra.mxu1 %v1688_v18 }
  0xef   : > { %v1217_v25 = vpop.eup %1216  ;;  %v414_v26 = vadd.f32 %v1681_v48, %v413_v22  ;;  %v518_v27 = vadd.f32 %v502_v21, %v411_v6  ;;  %v482_v28 = vmul.f32 0.044715, %v447_v20  ;;  %v545_v30 = vmul.f32 0.7978846, %v529_v24 }
  0xf0   : > { %v576_v29 = vadd.f32 1.0, %v1217_v25  ;;  %v466_v1 = vmul.f32 0.5, %v447_v20 }
  0xf1   : > { %v1219_v31 = vpop.eup %1218  ;;  %v534_v32 = vmul.f32 0.7978846, %v518_v27  ;;  %v498_v33 = vmul.f32 %v482_v28, %v447_v20  ;;  %v471_v34 = vmul.f32 0.044715, %v414_v26  ;;  %1220 = vtanh.f32 %v545_v30 }
  0xf2   : > { %v1693_v35 = vmul.f32 %v576_v29, %v464_v23  ;;  %v565_v37 = vadd.f32 1.0, %v1219_v31  ;;  %v455_v10 = vmul.f32 0.5, %v414_v26 }
  0xf3   : > { %1222 = vtanh.f32 %v534_v32  ;;  %v514_v38 = vmul.f32 %v498_v33, %v447_v20  ;;  %v487_v39 = vmul.f32 %v471_v34, %v414_v26 }
  0xf4   : > { %v449_v40 = vpop.f32.mrf.mxu3  ;;  %668 = vmatmul.f32.vlgmr.msrb.gmra.mxu3 %v1693_v35  ;;  %v1696_v41 = vmul.f32 %v565_v37, %v453_v36 }
  0xf5   : > { %v450_v42 = vadd.f32 %v1681_v48, %v449_v40  ;;  %v530_v43 = vadd.f32 %v514_v38, %v447_v20  ;;  %v503_v44 = vmul.f32 %v487_v39, %v414_v26 }
  0xf6   : > { %v416_v45 = vpop.f32.mrf.mxu0  ;;  %635 = vmatmul.f32.gmra.mxu1 %v1696_v41 }
  0xf7   : > { %v417_v46 = vadd.f32 %v1681_v48, %v416_v45  ;;  %v546_v49 = vmul.f32 0.7978846, %v530_v43  ;;  %v519_v50 = vadd.f32 %v503_v44, %v414_v26  ;;  %v1221_v51 = vpop.eup %1220  ;;  %v483_v52 = vmul.f32 0.044715, %v450_v42 }
  0xf8   : > { %v577_v54 = vadd.f32 1.0, %v1221_v51  ;;  %v467_v21 = vmul.f32 0.5, %v450_v42 }
  0xf9   : > { %v1223_v53 = vpop.eup %1222  ;;  %1224 = vtanh.f32 %v546_v49  ;;  %v535_v55 = vmul.f32 0.7978846, %v519_v50  ;;  %v499_v58 = vmul.f32 %v483_v52, %v450_v42  ;;  %v472_v59 = vmul.f32 0.044715, %v417_v46 }
  0xfa   : > { %v566_v57 = vadd.f32 1.0, %v1223_v53  ;;  %v1701_v60 = vmul.f32 %v577_v54, %v465_v47  ;;  %v456_v28 = vmul.f32 0.5, %v417_v46 }
  0xfb   : > { %1226 = vtanh.f32 %v535_v55  ;;  %v515_v62 = vmul.f32 %v499_v58, %v450_v42  ;;  %v488_v63 = vmul.f32 %v472_v59, %v417_v46 }
  0xfc   : > { %v1703_v61 = vmul.f32 %v566_v57, %v454_v56  ;;  %671 = vmatmul.f32.gmra.mxu3 %v1701_v60 }
  0xfd   : > { %v531_v2 = vadd.f32 %v515_v62, %v450_v42  ;;  %v504_v3 = vmul.f32 %v488_v63, %v417_v46 }
  0xfe   : > { %v419_v0 = vpop.f32.mrf.mxu0  ;;  %638 = vmatmul.f32.gmra.mxu1 %v1703_v61 }
  0xff   : > { %v1225_v4 = vpop.eup %1224  ;;  %v420_v5 = vadd.f32 %v1681_v48, %v419_v0  ;;  %v547_v7 = vmul.f32 0.7978846, %v531_v2  ;;  %v520_v8 = vadd.f32 %v504_v3, %v417_v46 }
 0x100   : > { %v578_v6 = vadd.f32 1.0, %v1225_v4 }
 0x101   : > { %v1227_v9 = vpop.eup %1226  ;;  %v473_v11 = vmul.f32 0.044715, %v420_v5  ;;  %1228 = vtanh.f32 %v547_v7  ;;  %v536_v14 = vmul.f32 0.7978846, %v520_v8  ;;  %v457_v42 = vmul.f32 0.5, %v420_v5 }
 0x102   : > { %v1708_v12 = vmul.f32 %v578_v6, %v466_v1  ;;  %v567_v13 = vadd.f32 1.0, %v1227_v9 }
 0x103   : > { %v489_v15 = vmul.f32 %v473_v11, %v420_v5  ;;  %1230 = vtanh.f32 %v536_v14  ;;  %v856_v11 = vld [vmem:[#allocation8 + $0x78] sm:$0xff] }
 0x104   : > { %v1710_v16 = vmul.f32 %v567_v13, %v455_v10  ;;  %674 = vmatmul.f32.gmra.mxu3 %v1708_v12  ;;  %v855_v13 = vld [vmem:[#allocation8 + $0x70] sm:$0xff]  ;;  %861 = vmatpush.msra.mxu2 %v856_v11 }
 0x105   : > { %v505_v17 = vmul.f32 %v489_v15, %v420_v5  ;;  %1114 = vmatpush.msra.mxu3 %v856_v11 }
 0x106   : > { %v422_v19 = vpop.f32.mrf.mxu0  ;;  %641 = vmatmul.f32.gmra.mxu1 %v1710_v16  ;;  %862 = vmatpush.msra.mxu2 %v855_v13 }
 0x107   : > { %v423_v20 = vadd.f32 %v1681_v48, %v422_v19  ;;  %v521_v22 = vadd.f32 %v505_v17, %v420_v5  ;;  %v1229_v23 = vpop.eup %1228  ;;  %v854_v19 = vld [vmem:[#allocation8 + $0x68] sm:$0xff]  ;;  %1115 = vmatpush.msra.mxu3 %v855_v13 }
 0x108   : > { %v579_v24 = vadd.f32 1.0, %v1229_v23  ;;  %863 = vmatpush.msra.mxu2 %v854_v19 }
 0x109   : > { %v537_v25 = vmul.f32 0.7978846, %v521_v22  ;;  %v474_v26 = vmul.f32 0.044715, %v423_v20  ;;  %v1231_v27 = vpop.eup %1230  ;;  %v458_v54 = vmul.f32 0.5, %v423_v20  ;;  %1116 = vmatpush.msra.mxu3 %v854_v19 }
 0x10a   : > { %v1715_v29 = vmul.f32 %v579_v24, %v467_v21  ;;  %v568_v30 = vadd.f32 1.0, %v1231_v27 }
 0x10b   : > { %1232 = vtanh.f32 %v537_v25  ;;  %v490_v31 = vmul.f32 %v474_v26, %v423_v20 }
 0x10c   : > { %677 = vmatmul.f32.gmra.mxu3 %v1715_v29  ;;  %v1718_v32 = vmul.f32 %v568_v30, %v456_v28 }
 0x10d   : > { %v506_v33 = vmul.f32 %v490_v31, %v423_v20 }
 0x10e   : > { %v425_v34 = vpop.f32.mrf.mxu0  ;;  %644 = vmatmul.f32.gmra.mxu1 %v1718_v32 }
 0x10f   : > { %v426_v36 = vadd.f32 %v1681_v48, %v425_v34  ;;  %v522_v37 = vadd.f32 %v506_v33, %v423_v20 }
 0x111   : > { %v1233_v38 = vpop.eup %1232  ;;  %v538_v39 = vmul.f32 0.7978846, %v522_v37  ;;  %v475_v40 = vmul.f32 0.044715, %v426_v36  ;;  %v459_v3 = vmul.f32 0.5, %v426_v36 }
 0x112   : > { %v569_v43 = vadd.f32 1.0, %v1233_v38 }
 0x113   : > { %1234 = vtanh.f32 %v538_v39  ;;  %v491_v44 = vmul.f32 %v475_v40, %v426_v36 }
 0x114   : > { %v1722_v45 = vmul.f32 %v569_v43, %v457_v42 }
 0x115   : > { %v507_v46 = vmul.f32 %v491_v44, %v426_v36 }
 0x116   : > { %v428_v47 = vpop.f32.mrf.mxu0  ;;  %647 = vmatmul.f32.gmra.mxu1 %v1722_v45 }
 0x117   : > { %v429_v49 = vadd.f32 %v1681_v48, %v428_v47  ;;  %v523_v50 = vadd.f32 %v507_v46, %v426_v36 }
 0x119   : > { %v1235_v51 = vpop.eup %1234  ;;  %v539_v52 = vmul.f32 0.7978846, %v523_v50  ;;  %v476_v53 = vmul.f32 0.044715, %v429_v49  ;;  %v460_v20 = vmul.f32 0.5, %v429_v49 }
 0x11a   : > { %v570_v55 = vadd.f32 1.0, %v1235_v51  ;;  %v853_v51 = vld [vmem:[#allocation8 + $0x60] sm:$0xff] }
 0x11b   : > { %1236 = vtanh.f32 %v539_v52  ;;  %v492_v56 = vmul.f32 %v476_v53, %v429_v49  ;;  %864 = vmatpush.msra.mxu2 %v853_v51  ;;  %1117 = vmatpush.msra.mxu3 %v853_v51  ;;  %v852_v52 = vld [vmem:[#allocation8 + $0x58] sm:$0xff]  ;;  %v851_v53 = vld [vmem:[#allocation8 + $0x50] sm:$0xff] }
 0x11c   : > { %v1726_v57 = vmul.f32 %v570_v55, %v458_v54  ;;  %v850_v54 = vld [vmem:[#allocation8 + $0x48] sm:$0xff]  ;;  %v849_v55 = vld [vmem:[#allocation8 + $0x40] sm:$0xff] }
 0x11d   : > { %v508_v58 = vmul.f32 %v492_v56, %v429_v49  ;;  %865 = vmatpush.msra.mxu2 %v852_v52  ;;  %1118 = vmatpush.msra.mxu3 %v852_v52  ;;  %v848_v56 = vld [vmem:[#allocation8 + $0x38] sm:$0xff] }
 0x11e   : > { %v431_v59 = vpop.f32.mrf.mxu0  ;;  %650 = vmatmul.f32.gmra.mxu1 %v1726_v57 }
 0x11f   : > { %v432_v62 = vadd.f32 %v1681_v48, %v431_v59  ;;  %v524_v63 = vadd.f32 %v508_v58, %v429_v49  ;;  %866 = vmatpush.msra.mxu2 %v851_v53  ;;  %1119 = vmatpush.msra.mxu3 %v851_v53  ;;  %v847_v58 = vld [vmem:[#allocation8 + $0x30] sm:$0xff]  ;;  %v846_v59 = vld [vmem:[#allocation8 + $0x28] sm:$0xff] }
 0x121   : > { %v1237_v0 = vpop.eup %1236  ;;  %v540_v1 = vmul.f32 0.7978846, %v524_v63  ;;  %v477_v2 = vmul.f32 0.044715, %v432_v62  ;;  %v461_v33 = vmul.f32 0.5, %v432_v62  ;;  %867 = vmatpush.msra.mxu2 %v850_v54  ;;  %1120 = vmatpush.msra.mxu3 %v850_v54  ;;  %v844_v63 = vld [vmem:[#allocation8 + $0x18] sm:$0xff] }
 0x122   : > { %v571_v4 = vadd.f32 1.0, %v1237_v0  ;;  %v843_v0 = vld [vmem:[#allocation8 + $0x10] sm:$0xff] }
 0x123   : > { %1238 = vtanh.f32 %v540_v1  ;;  %v493_v5 = vmul.f32 %v477_v2, %v432_v62  ;;  %868 = vmatpush.msra.mxu2 %v849_v55  ;;  %1121 = vmatpush.msra.mxu3 %v849_v55  ;;  %v842_v1 = vld [vmem:[#allocation8 + $0x8] sm:$0xff]  ;;  %v841_v2 = vld [vmem:[#allocation8] sm:$0xff] }
 0x124   : > { %v1730_v6 = vmul.f32 %v571_v4, %v459_v3  ;;  %v1750_v3 = vld [vmem:[%s1852_s4] ss:$0 sm:$0xff] }
 0x125   : > { %v509_v7 = vmul.f32 %v493_v5, %v432_v62  ;;  %869 = vmatpush.msra.mxu2 %v848_v56  ;;  %1122 = vmatpush.msra.mxu3 %v848_v56 }
 0x126   : > { %v434_v8 = vpop.f32.mrf.mxu0  ;;  %653 = vmatmul.f32.gmra.mxu1 %v1730_v6 }
 0x127   : > { %v435_v9 = vadd.f32 %v1681_v48, %v434_v8  ;;  %v525_v10 = vadd.f32 %v509_v7, %v432_v62  ;;  %870 = vmatpush.msra.mxu2 %v847_v58  ;;  %1123 = vmatpush.msra.mxu3 %v847_v58  ;;  %v845_v62 = vld [vmem:[#allocation8 + $0x20] sm:$0xff] }
 0x129   : > { %v1239_v14 = vpop.eup %1238  ;;  %v541_v15 = vmul.f32 0.7978846, %v525_v10  ;;  %v478_v17 = vmul.f32 0.044715, %v435_v9  ;;  %v462_v43 = vmul.f32 0.5, %v435_v9  ;;  %871 = vmatpush.msra.mxu2 %v846_v59  ;;  %1124 = vmatpush.msra.mxu3 %v846_v59 }
 0x12a   : > { %v572_v21 = vadd.f32 1.0, %v1239_v14 }
 0x12b   : > { %1240 = vtanh.f32 %v541_v15  ;;  %v494_v22 = vmul.f32 %v478_v17, %v435_v9  ;;  %872 = vmatpush.msra.mxu2 %v845_v62  ;;  %1125 = vmatpush.msra.mxu3 %v845_v62 }
 0x12c   : > { %v1734_v23 = vmul.f32 %v572_v21, %v460_v20 }
 0x12d   : > { %v510_v24 = vmul.f32 %v494_v22, %v435_v9  ;;  %873 = vmatpush.msra.mxu2 %v844_v63  ;;  %1126 = vmatpush.msra.mxu3 %v844_v63 }
 0x12e   : > { %v437_v25 = vpop.f32.mrf.mxu0  ;;  %656 = vmatmul.f32.gmra.mxu1 %v1734_v23 }
 0x12f   : > { %v438_v26 = vadd.f32 %v1681_v48, %v437_v25  ;;  %v526_v27 = vadd.f32 %v510_v24, %v435_v9  ;;  %874 = vmatpush.msra.mxu2 %v843_v0  ;;  %1127 = vmatpush.msra.mxu3 %v843_v0 }
 0x131   : > { %v1241_v28 = vpop.eup %1240  ;;  %v542_v30 = vmul.f32 0.7978846, %v526_v27  ;;  %v479_v31 = vmul.f32 0.044715, %v438_v26  ;;  %v463_v47 = vmul.f32 0.5, %v438_v26  ;;  %875 = vmatpush.msra.mxu2 %v842_v1  ;;  %1128 = vmatpush.msra.mxu3 %v842_v1 }
 0x132   : > { %v573_v34 = vadd.f32 1.0, %v1241_v28 }
 0x133   : > { %1242 = vtanh.f32 %v542_v30  ;;  %v495_v36 = vmul.f32 %v479_v31, %v438_v26  ;;  %876 = vmatpush.msra.mxu2 %v841_v2  ;;  %1129 = vmatpush.msra.mxu3 %v841_v2 }
 0x134   : > { %v1738_v37 = vmul.f32 %v573_v34, %v461_v33 }
 0x135   : > { %v511_v38 = vmul.f32 %v495_v36, %v438_v26 }
 0x136   : > { %659 = vmatmul.f32.gmra.mxu1 %v1738_v37 }
 0x137   : > { %v527_v39 = vadd.f32 %v511_v38, %v438_v26 }
 0x139   : > { %v1243_v40 = vpop.eup %1242  ;;  %v543_v42 = vmul.f32 0.7978846, %v527_v39 }
 0x13a   : > { %v574_v48 = vadd.f32 1.0, %v1243_v40 }
 0x13b   : > { %1244 = vtanh.f32 %v543_v42 }
 0x13c   : > { %v1741_v44 = vmul.f32 %v574_v48, %v462_v43 }
 0x13e   : > { %662 = vmatmul.f32.gmra.mxu1 %v1741_v44 }
 0x141   : > { %v1245_v46 = vpop.eup %1244 }
 0x142   : > { %v575_v49 = vadd.f32 1.0, %v1245_v46 }
 0x144   : > { %v1744_v50 = vmul.f32 %v575_v49, %v463_v47 }
 0x146   : > { %665 = vmatmul.f32.gmra.mxu1 %v1744_v50 }
 0x16b   : > { %v633_v4 = vpop.f32.mrf.mxu1 }
 0x16c   : > { %v634_v5 = vadd.f32 %v1750_v3, %v633_v4 }
 0x16e   : > { %v681_v7 = vadd.f32 %v634_v5, %v1688_v18 }
 0x170   : > { %v713_v8 = vmul.f32 0.044715, %v681_v7  ;;  %v697_v40 = vmul.f32 0.5, %v681_v7 }
 0x172   : > { %v729_v9 = vmul.f32 %v713_v8, %v681_v7 }
 0x173   : > { %v636_v10 = vpop.f32.mrf.mxu1 }
 0x174   : > { %v637_v11 = vadd.f32 %v1750_v3, %v636_v10  ;;  %v745_v13 = vmul.f32 %v729_v9, %v681_v7 }
 0x176   : > { %v682_v14 = vadd.f32 %v637_v11, %v1696_v41  ;;  %v761_v15 = vadd.f32 %v745_v13, %v681_v7 }
 0x177   : > { %v669_v17 = vpop.f32.mrf.mxu3 }
 0x178   : > { %v670_v19 = vadd.f32 %v1750_v3, %v669_v17  ;;  %v777_v20 = vmul.f32 0.7978846, %v761_v15  ;;  %v714_v21 = vmul.f32 0.044715, %v682_v14 }
 0x17a   : > { %v693_v22 = vadd.f32 %v670_v19, %v1693_v35  ;;  %1246 = vtanh.f32 %v777_v20  ;;  %v730_v24 = vmul.f32 %v714_v21, %v682_v14 }
 0x17b   : > { %v639_v25 = vpop.f32.mrf.mxu1 }
 0x17c   : > { %v725_v18 = vmul.f32 0.044715, %v693_v22  ;;  %v640_v26 = vadd.f32 %v1750_v3, %v639_v25  ;;  %v746_v27 = vmul.f32 %v730_v24, %v682_v14  ;;  %v709_v11 = vmul.f32 0.5, %v693_v22 }
 0x17e   : > { %v741_v28 = vmul.f32 %v725_v18, %v693_v22  ;;  %v683_v30 = vadd.f32 %v640_v26, %v1703_v61  ;;  %v762_v31 = vadd.f32 %v746_v27, %v682_v14 }
 0x17f   : > { %v672_v33 = vpop.f32.mrf.mxu3 }
 0x180   : > { %v1247_v41 = vpop.eup %1246  ;;  %v778_v34 = vmul.f32 0.7978846, %v762_v31  ;;  %v757_v36 = vmul.f32 %v741_v28, %v693_v22  ;;  %v715_v38 = vmul.f32 0.044715, %v683_v30  ;;  %v673_v39 = vadd.f32 %v1750_v3, %v672_v33 }
 0x181   : > { %v809_v35 = vadd.f32 1.0, %v1247_v41  ;;  %v699_v26 = vmul.f32 0.5, %v683_v30 }
 0x182   : > { %1248 = vtanh.f32 %v778_v34  ;;  %v773_v42 = vadd.f32 %v757_v36, %v693_v22  ;;  %v731_v43 = vmul.f32 %v715_v38, %v683_v30  ;;  %v694_v48 = vadd.f32 %v673_v39, %v1701_v60 }
 0x183   : > { %v642_v46 = vpop.f32.mrf.mxu1  ;;  %v825_v47 = vmul.f32 %v809_v35, %v697_v40  ;;  %v698_v60 = vmul.f32 0.5, %v682_v14 }
 0x184   : > { %v643_v49 = vadd.f32 %v1750_v3, %v642_v46  ;;  %v789_v61 = vmul.f32 0.7978846, %v773_v42  ;;  %v747_v51 = vmul.f32 %v731_v43, %v683_v30  ;;  %v726_v52 = vmul.f32 0.044715, %v694_v48 }
 0x185   : > { %877 = vmatmul.f32.vlgmr.msra.gmra.mxu2 %v825_v47  ;;  %v710_v35 = vmul.f32 0.5, %v694_v48 }
 0x186   : > { %v684_v53 = vadd.f32 %v643_v49, %v1710_v16  ;;  %1250 = vtanh.f32 %v789_v61  ;;  %v763_v54 = vadd.f32 %v747_v51, %v683_v30  ;;  %v742_v55 = vmul.f32 %v726_v52, %v694_v48 }
 0x187   : > { %v675_v58 = vpop.f32.mrf.mxu3 }
 0x188   : > { %v1249_v56 = vpop.eup %1248  ;;  %v779_v59 = vmul.f32 0.7978846, %v763_v54  ;;  %v716_v62 = vmul.f32 0.044715, %v684_v53  ;;  %v676_v63 = vadd.f32 %v1750_v3, %v675_v58  ;;  %v758_v1 = vmul.f32 %v742_v55, %v694_v48 }
 0x189   : > { %v810_v0 = vadd.f32 1.0, %v1249_v56  ;;  %v700_v61 = vmul.f32 0.5, %v684_v53 }
 0x18a   : > { %1252 = vtanh.f32 %v779_v59  ;;  %v732_v2 = vmul.f32 %v716_v62, %v684_v53  ;;  %v1766_v4 = vadd.f32 %v676_v63, %v1708_v12  ;;  %v774_v7 = vadd.f32 %v758_v1, %v694_v48 }
 0x18b   : > { %v826_v5 = vmul.f32 %v810_v0, %v698_v60  ;;  %v645_v8 = vpop.f32.mrf.mxu1 }
 0x18c   : > { %v1251_v16 = vpop.eup %1250  ;;  %v748_v9 = vmul.f32 %v732_v2, %v684_v53  ;;  %v646_v10 = vadd.f32 %v1750_v3, %v645_v8  ;;  %v790_v15 = vmul.f32 0.7978846, %v774_v7  ;;  %v727_v14 = vmul.f32 0.044715, %v1766_v4 }
 0x18d   : > { %880 = vmatmul.f32.gmra.mxu2 %v826_v5  ;;  %v821_v13 = vadd.f32 1.0, %v1251_v16 }
 0x18e   : > { %v764_v17 = vadd.f32 %v748_v9, %v684_v53  ;;  %v685_v19 = vadd.f32 %v646_v10, %v1718_v32  ;;  %1254 = vtanh.f32 %v790_v15  ;;  %v743_v25 = vmul.f32 %v727_v14, %v1766_v4 }
 0x18f   : > { %v837_v20 = vmul.f32 %v821_v13, %v709_v11  ;;  %v678_v21 = vpop.f32.mrf.mxu3  ;;  %v711_v53 = vmul.f32 0.5, %v1766_v4 }
 0x190   : > { %v1253_v12 = vpop.eup %1252  ;;  %v780_v24 = vmul.f32 0.7978846, %v764_v17  ;;  %v679_v18 = vadd.f32 %v1750_v3, %v678_v21  ;;  %v717_v22 = vmul.f32 0.044715, %v685_v19  ;;  %v759_v28 = vmul.f32 %v743_v25, %v1766_v4 }
 0x191   : > { %913 = vmatmul.f32.vlgmr.msra.gmra.mxu3 %v837_v20  ;;  %v811_v27 = vadd.f32 1.0, %v1253_v12  ;;  %v701_v8 = vmul.f32 0.5, %v685_v19 }
 0x192   : > { %1256 = vtanh.f32 %v780_v24  ;;  %v696_v31 = vadd.f32 %v679_v18, %v1715_v29  ;;  %v733_v32 = vmul.f32 %v717_v22, %v685_v19  ;;  %v775_v34 = vadd.f32 %v759_v28, %v1766_v4 }
 0x193   : > { %v827_v41 = vmul.f32 %v811_v27, %v699_v26  ;;  %v648_v33 = vpop.f32.mrf.mxu1 }
 0x194   : > { %v1255_v36 = vpop.eup %1254  ;;  %v649_v38 = vadd.f32 %v1750_v3, %v648_v33  ;;  %v749_v39 = vmul.f32 %v733_v32, %v685_v19  ;;  %v728_v40 = vmul.f32 0.044715, %v696_v31  ;;  %v791_v42 = vmul.f32 0.7978846, %v775_v34 }
 0x195   : > { %883 = vmatmul.f32.gmra.mxu2 %v827_v41  ;;  %v822_v30 = vadd.f32 1.0, %v1255_v36  ;;  %v712_v4 = vmul.f32 0.5, %v696_v31 }
 0x196   : > { %v686_v43 = vadd.f32 %v649_v38, %v1722_v45  ;;  %v765_v46 = vadd.f32 %v749_v39, %v685_v19  ;;  %v744_v47 = vmul.f32 %v728_v40, %v696_v31  ;;  %1258 = vtanh.f32 %v791_v42 }
 0x197   : > { %v838_v29 = vmul.f32 %v822_v30, %v710_v35 }
 0x198   : > { %v1257_v49 = vpop.eup %1256  ;;  %v781_v52 = vmul.f32 0.7978846, %v765_v46  ;;  %v760_v54 = vmul.f32 %v744_v47, %v696_v31  ;;  %v718_v55 = vmul.f32 0.044715, %v686_v43  ;;  %v702_v26 = vmul.f32 0.5, %v686_v43 }
 0x199   : > { %v812_v51 = vadd.f32 1.0, %v1257_v49  ;;  %916 = vmatmul.f32.gmra.mxu3 %v838_v29 }
 0x19a   : > { %1260 = vtanh.f32 %v781_v52  ;;  %v776_v58 = vadd.f32 %v760_v54, %v696_v31  ;;  %v734_v48 = vmul.f32 %v718_v55, %v686_v43 }
 0x19b   : > { %v828_v56 = vmul.f32 %v812_v51, %v700_v61  ;;  %v651_v59 = vpop.f32.mrf.mxu1 }
 0x19c   : > { %v652_v62 = vadd.f32 %v1750_v3, %v651_v59  ;;  %v792_v45 = vmul.f32 0.7978846, %v776_v58  ;;  %v1259_v63 = vpop.eup %1258  ;;  %v750_v60 = vmul.f32 %v734_v48, %v686_v43 }
 0x19d   : > { %886 = vmatmul.f32.gmra.mxu2 %v828_v56  ;;  %v823_v1 = vadd.f32 1.0, %v1259_v63 }
 0x19e   : > { %v687_v0 = vadd.f32 %v652_v62, %v1726_v57  ;;  %1262 = vtanh.f32 %v792_v45  ;;  %v766_v2 = vadd.f32 %v750_v60, %v686_v43 }
 0x19f   : > { %v839_v7 = vmul.f32 %v823_v1, %v711_v53 }
 0x1a0   : > { %v1261_v5 = vpop.eup %1260  ;;  %v719_v16 = vmul.f32 0.044715, %v687_v0  ;;  %v782_v10 = vmul.f32 0.7978846, %v766_v2  ;;  %v703_v39 = vmul.f32 0.5, %v687_v0 }
 0x1a1   : > { %v813_v9 = vadd.f32 1.0, %v1261_v5  ;;  %919 = vmatmul.f32.gmra.mxu3 %v839_v7 }
 0x1a2   : > { %v735_v11 = vmul.f32 %v719_v16, %v687_v0  ;;  %1264 = vtanh.f32 %v782_v10 }
 0x1a3   : > { %v654_v13 = vpop.f32.mrf.mxu1  ;;  %v829_v15 = vmul.f32 %v813_v9, %v701_v8 }
 0x1a4   : > { %v1263_v17 = vpop.eup %1262  ;;  %v655_v14 = vadd.f32 %v1750_v3, %v654_v13  ;;  %v751_v57 = vmul.f32 %v735_v11, %v687_v0 }
 0x1a5   : > { %889 = vmatmul.f32.gmra.mxu2 %v829_v15  ;;  %v824_v20 = vadd.f32 1.0, %v1263_v17 }
 0x1a6   : > { %v688_v12 = vadd.f32 %v655_v14, %v1730_v6  ;;  %v767_v21 = vadd.f32 %v751_v57, %v687_v0 }
 0x1a7   : > { %v840_v24 = vmul.f32 %v824_v20, %v712_v4 }
 0x1a8   : > { %v783_v25 = vmul.f32 0.7978846, %v767_v21  ;;  %v720_v19 = vmul.f32 0.044715, %v688_v12  ;;  %v1265_v18 = vpop.eup %1264  ;;  %v704_v51 = vmul.f32 0.5, %v688_v12 }
 0x1a9   : > { %922 = vmatmul.f32.gmra.mxu3 %v840_v24  ;;  %v814_v27 = vadd.f32 1.0, %v1265_v18  ;;  %v1213_v18 = vld [vmem:[%s1854_s6] ss:$0 sm:$0xff] }
 0x1aa   : > { %1266 = vtanh.f32 %v783_v25  ;;  %v736_v22 = vmul.f32 %v720_v19, %v688_v12 }
 0x1ab   : > { %v657_v28 = vpop.f32.mrf.mxu1  ;;  %v830_v32 = vmul.f32 %v814_v27, %v702_v26 }
 0x1ac   : > { %v658_v41 = vadd.f32 %v1750_v3, %v657_v28  ;;  %v752_v33 = vmul.f32 %v736_v22, %v688_v12 }
 0x1ad   : > { %892 = vmatmul.f32.gmra.mxu2 %v830_v32 }
 0x1ae   : > { %v689_v31 = vadd.f32 %v658_v41, %v1734_v23  ;;  %v768_v34 = vadd.f32 %v752_v33, %v688_v12 }
 0x1b0   : > { %v1267_v6 = vpop.eup %1266  ;;  %v784_v36 = vmul.f32 0.7978846, %v768_v34  ;;  %v721_v38 = vmul.f32 0.044715, %v689_v31  ;;  %v705_v60 = vmul.f32 0.5, %v689_v31 }
 0x1b1   : > { %v815_v40 = vadd.f32 1.0, %v1267_v6 }
 0x1b2   : > { %1268 = vtanh.f32 %v784_v36  ;;  %v737_v35 = vmul.f32 %v721_v38, %v689_v31 }
 0x1b3   : > { %v660_v30 = vpop.f32.mrf.mxu1  ;;  %v831_v42 = vmul.f32 %v815_v40, %v703_v39 }
 0x1b4   : > { %v661_v43 = vadd.f32 %v1750_v3, %v660_v30  ;;  %v753_v46 = vmul.f32 %v737_v35, %v689_v31 }
 0x1b5   : > { %895 = vmatmul.f32.gmra.mxu2 %v831_v42 }
 0x1b6   : > { %v690_v47 = vadd.f32 %v661_v43, %v1738_v37  ;;  %v769_v49 = vadd.f32 %v753_v46, %v689_v31 }
 0x1b8   : > { %v1269_v29 = vpop.eup %1268  ;;  %v785_v23 = vmul.f32 0.7978846, %v769_v49  ;;  %v722_v61 = vmul.f32 0.044715, %v690_v47  ;;  %v706_v11 = vmul.f32 0.5, %v690_v47 }
 0x1b9   : > { %v816_v52 = vadd.f32 1.0, %v1269_v29 }
 0x1ba   : > { %1270 = vtanh.f32 %v785_v23  ;;  %v738_v54 = vmul.f32 %v722_v61, %v690_v47 }
 0x1bb   : > { %v663_v55 = vpop.f32.mrf.mxu1  ;;  %v832_v56 = vmul.f32 %v816_v52, %v704_v51 }
 0x1bc   : > { %v664_v58 = vadd.f32 %v1750_v3, %v663_v55  ;;  %v754_v59 = vmul.f32 %v738_v54, %v690_v47 }
 0x1bd   : > { %898 = vmatmul.f32.gmra.mxu2 %v832_v56 }
 0x1be   : > { %v691_v48 = vadd.f32 %v664_v58, %v1741_v44  ;;  %v770_v62 = vadd.f32 %v754_v59, %v690_v47 }
 0x1c0   : > { %v1271_v45 = vpop.eup %1270  ;;  %v786_v37 = vmul.f32 0.7978846, %v770_v62  ;;  %v723_v63 = vmul.f32 0.044715, %v691_v48 }
 0x1c1   : > { %v817_v0 = vadd.f32 1.0, %v1271_v45 }
 0x1c2   : > { %1272 = vtanh.f32 %v786_v37  ;;  %v739_v53 = vmul.f32 %v723_v63, %v691_v48 }
 0x1c3   : > { %v666_v1 = vpop.f32.mrf.mxu1  ;;  %v833_v2 = vmul.f32 %v817_v0, %v705_v60 }
 0x1c4   : > { %v667_v5 = vadd.f32 %v1750_v3, %v666_v1  ;;  %v755_v7 = vmul.f32 %v739_v53, %v691_v48  ;;  %v707_v3 = vmul.f32 0.5, %v691_v48 }
 0x1c5   : > { %901 = vmatmul.f32.gmra.mxu2 %v833_v2 }
 0x1c6   : > { %v692_v16 = vadd.f32 %v667_v5, %v1744_v50  ;;  %v771_v8 = vadd.f32 %v755_v7, %v691_v48 }
 0x1c8   : > { %v1273_v9 = vpop.eup %1272  ;;  %v787_v44 = vmul.f32 0.7978846, %v771_v8  ;;  %v724_v10 = vmul.f32 0.044715, %v692_v16  ;;  %v708_v24 = vmul.f32 0.5, %v692_v16 }
 0x1c9   : > { %v818_v13 = vadd.f32 1.0, %v1273_v9 }
 0x1ca   : > { %1274 = vtanh.f32 %v787_v44  ;;  %v740_v15 = vmul.f32 %v724_v10, %v692_v16 }
 0x1cb   : > { %v834_v17 = vmul.f32 %v818_v13, %v706_v11 }
 0x1cc   : > { %v756_v14 = vmul.f32 %v740_v15, %v692_v16 }
 0x1cd   : > { %904 = vmatmul.f32.gmra.mxu2 %v834_v17 }
 0x1ce   : > { %v772_v57 = vadd.f32 %v756_v14, %v692_v16 }
 0x1d0   : > { %v1275_v4 = vpop.eup %1274  ;;  %v788_v20 = vmul.f32 0.7978846, %v772_v57 }
 0x1d1   : > { %v819_v12 = vadd.f32 1.0, %v1275_v4 }
 0x1d2   : > { %1276 = vtanh.f32 %v788_v20 }
 0x1d3   : > { %v835_v50 = vmul.f32 %v819_v12, %v707_v3 }
 0x1d5   : > { %907 = vmatmul.f32.gmra.mxu2 %v835_v50 }
 0x1d8   : > { %v1277_v21 = vpop.eup %1276 }
 0x1d9   : > { %v820_v25 = vadd.f32 1.0, %v1277_v21 }
 0x1db   : > { %v836_v19 = vmul.f32 %v820_v25, %v708_v24 }
 0x1dd   : > { %910 = vmatmul.f32.gmra.mxu2 %v836_v19 }
 0x208   : > { %v878_v26 = vpop.f32.mrf.mxu2 }
 0x209   : > { %v879_v27 = vadd.f32 %v1213_v18, %v878_v26 }
 0x20b   : > { %926 = vst [vmem:[%s1796_s22] sm:$0xff] %v879_v27 }
 0x210   : > { %v881_v22 = vpop.f32.mrf.mxu2 }
 0x211   : > { %v882_v28 = vadd.f32 %v1213_v18, %v881_v22 }
 0x213   : > { %927 = vst [vmem:[%s1796_s22 + $0x8] sm:$0xff] %v882_v28 }
 0x214   : > { %v914_v41 = vpop.f32.mrf.mxu3 }
 0x215   : > { %v915_v32 = vadd.f32 %v1213_v18, %v914_v41 }
 0x217   : > { %938 = vst [vmem:[%s1796_s22 + $0x60] sm:$0xff] %v915_v32 }
 0x218   : > { %v884_v33 = vpop.f32.mrf.mxu2 }
 0x219   : > { %v885_v31 = vadd.f32 %v1213_v18, %v884_v33 }
 0x21b   : > { %928 = vst [vmem:[%s1796_s22 + $0x10] sm:$0xff] %v885_v31 }
 0x21c   : > { %v917_v34 = vpop.f32.mrf.mxu3 }
 0x21d   : > { %v918_v6 = vadd.f32 %v1213_v18, %v917_v34 }
 0x21f   : > { %939 = vst [vmem:[%s1796_s22 + $0x68] sm:$0xff] %v918_v6 }
 0x220   : > { %v887_v36 = vpop.f32.mrf.mxu2 }
 0x221   : > { %v888_v38 = vadd.f32 %v1213_v18, %v887_v36 }
 0x223   : > { %929 = vst [vmem:[%s1796_s22 + $0x18] sm:$0xff] %v888_v38 }
 0x224   : > { %v920_v39 = vpop.f32.mrf.mxu3 }
 0x225   : > { %v921_v40 = vadd.f32 %v1213_v18, %v920_v39 }
 0x227   : > { %940 = vst [vmem:[%s1796_s22 + $0x70] sm:$0xff] %v921_v40 }
 0x228   : > { %v890_v35 = vpop.f32.mrf.mxu2 }
 0x229   : > { %v891_v30 = vadd.f32 %v1213_v18, %v890_v35 }
 0x22b   : > { %930 = vst [vmem:[%s1796_s22 + $0x20] sm:$0xff] %v891_v30 }
 0x22c   : > { %v923_v42 = vpop.f32.mrf.mxu3 }
 0x22d   : > { %v924_v43 = vadd.f32 %v1213_v18, %v923_v42 }
 0x22f   : > { %941 = vst [vmem:[%s1796_s22 + $0x78] sm:$0xff] %v924_v43 }
 0x230   : > { %v893_v46 = vpop.f32.mrf.mxu2 }
 0x231   : > { %v894_v47 = vadd.f32 %v1213_v18, %v893_v46 }
 0x233   : > { %931 = vst [vmem:[%s1796_s22 + $0x28] sm:$0xff] %v894_v47 }
 0x238   : > { %v896_v49 = vpop.f32.mrf.mxu2 }
 0x239   : > { %v897_v29 = vadd.f32 %v1213_v18, %v896_v49 }
 0x23b   : > { %932 = vst [vmem:[%s1796_s22 + $0x30] sm:$0xff] %v897_v29 }
 0x240   : > { %v899_v23 = vpop.f32.mrf.mxu2 }
 0x241   : > { %v900_v61 = vadd.f32 %v1213_v18, %v899_v23 }
 0x243   : > { %933 = vst [vmem:[%s1796_s22 + $0x38] sm:$0xff] %v900_v61 }
 0x248   : > { %v902_v51 = vpop.f32.mrf.mxu2 }
 0x249   : > { %v903_v52 = vadd.f32 %v1213_v18, %v902_v51 }
 0x24b   : > { %934 = vst [vmem:[%s1796_s22 + $0x40] sm:$0xff] %v903_v52 }
 0x250   : > { %v905_v54 = vpop.f32.mrf.mxu2 }
 0x251   : > { %v906_v55 = vadd.f32 %v1213_v18, %v905_v54 }
 0x253   : > { %935 = vst [vmem:[%s1796_s22 + $0x48] sm:$0xff] %v906_v55 }
 0x258   : > { %v908_v56 = vpop.f32.mrf.mxu2 }
 0x259   : > { %v909_v58 = vadd.f32 %v1213_v18, %v908_v56 }
 0x25b   : > { %936 = vst [vmem:[%s1796_s22 + $0x50] sm:$0xff] %v909_v58 }
 0x260   : > { %v911_v59 = vpop.f32.mrf.mxu2 }
 0x261   : > { %v912_v48 = vadd.f32 %v1213_v18, %v911_v59 }
 0x263   : > { %937 = vst [vmem:[%s1796_s22 + $0x58] sm:$0xff] %v912_v48 }
 0x264   : > { %1425 = shalt.err (!%p1422_p10)
}
 0x265   : > { %s1479_s15 = smov 128   ;;  %s1480_s22 = smov 8  }
 0x266   : > { %1144 = dma.vmem_to_hbm [thread:$0]  (%p1612_p3), %s956_s1, 2048, %s958_s20, %s943_s23, %s1479_s15, %s1479_s15, %s1480_s22  }
 0x267 PF: > { %s972_s29 = sand.u32 1, %s1460_s24   ;;  %p1868_p12 = scmp.ge.s32.totalorder %s1472_s27, 2 }
 0x268   : > { %s973_s9 = scalar_lea.sflag [#allocation4], %s972_s29 }
 0x269   : > { %p1161_p13 = pnand %p1868_p12, %p1556_p6 }
 0x26b   : > { %p1162_p0 = pneg %p1161_p13 }
 0x26d   : > { %1455 = dma.done.wait (%p1162_p0), %s973_s9, 2048  }
 0x26e   : > { %1457 = vsyncadd (%p1162_p0), %s973_s9, 4294965248  ;;  %p22_p5 = scmp.ge.s32.totalorder %s1594_s13, 4   ;;  %s1869_s24 = smov %s1464_s25 }
 0x26f   : > { %s1870_s25 = smov %s1468_s26  ;;  %s1871_s26 = smov %s1608_s17 }
 0x270   : > { %s1872_s27 = smov %s1594_s13  ;;  %24 = sbr.rel (!%p22_p5) target bundleno = 9 (0x9), region = 105 }
 0x275   :  { %979 = vsyncpa [#allocation3], 1 }
 0x276   :  { %981 = vsyncpa [#allocation3 + $0x1], 1 }
 0x277   :  { %982 = vsyncpa [#allocation6], 1 }
 0x278   :  { %983 = vsyncpa [#allocation9], 1 }
 0x279   :  { %984 = vsyncpa [#allocation4], 1 }
 0x27a   :  { %986 = vsyncpa [#allocation4 + $0x1], 1 }

</bundles_post_ra>
